<compile_context>
chip_gen: v7x
topology: tpu7x:2x2x1
jax: 0.10.0
libtpu: 0.0.40
codegen_flags: <defaults>
</compile_context>

<pallas_src>
import functools

import jax
import jax.numpy as jnp
from jax.experimental import pallas as pl
from jax.experimental.pallas import tpu as pltpu


# --------------------------------------------------------------------------------------
# Helpers
# --------------------------------------------------------------------------------------

def _vmem_budget_bytes():
    """Generation-aware VMEM budget: ~75% of per-core capacity (leaves Mosaic headroom)."""
    try:
        cap = pltpu.get_tpu_info().vmem_capacity_bytes
    except Exception:
        cap = 64 * 1024 * 1024  # conservative fallback (v7x-sized) if detection fails
    return int(cap) * 3 // 4


def _largest_divisor_leq(n, cap):
    cap = max(1, min(n, cap))
    for b in range(cap, 0, -1):
        if n % b == 0:
            return b
    return 1


# --------------------------------------------------------------------------------------
# Path A: fused single pass (small / medium feature maps)
# --------------------------------------------------------------------------------------

def _fused_kernel(x_ref, w1_ref, b1_ref, w2_ref, b2_ref, o_ref, *, batch, inv_p):
    # x_ref : (B, C, P)   B samples, channels on sublanes, spatial on lanes (native dtype)
    # w1_ref: (Cm, C)  b1_ref: (Cm, 1)  w2_ref: (C, Cm)  b2_ref: (C, 1)   (resident)
    # o_ref : (B, C, P)
    w1 = w1_ref[...].astype(jnp.float32)
    b1 = b1_ref[...].astype(jnp.float32)
    w2 = w2_ref[...].astype(jnp.float32)
    b2 = b2_ref[...].astype(jnp.float32)

    for b in range(batch):  # static unroll; batch is small (<= 16)
        xb = x_ref[b]  # (C, P) — keep native width, no full f32 slab copy
        # AdaptiveAvgPool2d(1): lane reduce with f32 accumulation.
        pooled = jnp.sum(xb, axis=-1, keepdims=True, dtype=jnp.float32) * inv_p   # (C, 1)
        # Squeeze 1x1 conv + ReLU, excite 1x1 conv + Sigmoid (tiny; latency negligible
        # once the kernel is HBM-bound).
        h = jnp.maximum(jnp.dot(w1, pooled, preferred_element_type=jnp.float32) + b1, 0.0)
        gate = jax.nn.sigmoid(jnp.dot(w2, h, preferred_element_type=jnp.float32) + b2)  # (C, 1)
        # Rescale in native width (gate broadcast over the lane/spatial dim).
        o_ref[b] = (xb * gate.astype(xb.dtype)).astype(o_ref.dtype)


def _fused_call(x3, w1c, b1c, w2c, b2c, *, N, C, Cm, P, budget):
    isz = jnp.dtype(x3.dtype).itemsize
    slab = C * P * isz
    # 2 input bufs + 2 output bufs per sample under default double-buffering.
    b_vmem = max(1, (budget - 2 * 1024 * 1024) // (4 * slab))
    # Keep >= 2 grid steps when N >= 2 so a v7x megacore can split the "parallel" axis.
    b_cap = min(16, b_vmem, N if N == 1 else max(1, N // 2))
    B = _largest_divisor_leq(N, b_cap)
    grid = (N // B,)

    kernel = functools.partial(_fused_kernel, batch=B, inv_p=1.0 / P)
    cost = pl.CostEstimate(
        flops=int(2 * N * C * P + 4 * N * C * Cm),
        transcendentals=int(N * C),
        bytes_accessed=int(2 * N * C * P * isz + (2 * C * Cm + C + Cm) * 4),
    )
    # TODO(synk): for N == 1 on v7x the single parallel grid step leaves one TensorCore
    # idle; the two-pass spatially-tiled path below could be used instead at 1.5x HBM cost.
    return pl.pallas_call(
        kernel,
        out_shape=jax.ShapeDtypeStruct((N, C, P), x3.dtype),
        grid=grid,
        in_specs=[
            pl.BlockSpec((B, C, P), lambda i: (i, 0, 0)),   # activation slab (read once)
            pl.BlockSpec((Cm, C), lambda i: (0, 0)),        # weights resident across grid
            pl.BlockSpec((Cm, 1), lambda i: (0, 0)),
            pl.BlockSpec((C, Cm), lambda i: (0, 0)),
            pl.BlockSpec((C, 1), lambda i: (0, 0)),
        ],
        out_specs=pl.BlockSpec((B, C, P), lambda i: (i, 0, 0)),
        compiler_params=pltpu.CompilerParams(
            dimension_semantics=("parallel",),
            vmem_limit_bytes=budget,
        ),
        cost_estimate=cost,
    )(x3, w1c, b1c, w2c, b2c)


# --------------------------------------------------------------------------------------
# Path B: two-pass tiled (large feature maps that don't fit the VMEM budget)
# --------------------------------------------------------------------------------------

def _gate_kernel(x_ref, w1_ref, b1_ref, w2_ref, b2_ref, gate_ref, *,
                 p_total, tile_p, ragged, inv_p):
    # Accumulate per-channel spatial sums directly into the f32 gate output block
    # (resident across the "arbitrary" spatial axis); finalize with the tiny MLP.
    p = pl.program_id(1)

    @pl.when(p == 0)
    def _init():
        gate_ref[...] = jnp.zeros_like(gate_ref)

    xt = x_ref[...]                                            # (C, tile_p)
    if ragged:  # static: mask lanes past the true spatial extent on the last tile
        lane = jax.lax.broadcasted_iota(jnp.int32, xt.shape, 1)
        xt = jnp.where(p * tile_p + lane < p_total, xt, jnp.zeros_like(xt))
    gate_ref[...] += jnp.sum(xt, axis=-1, keepdims=True, dtype=jnp.float32)

    @pl.when(p == pl.num_programs(1) - 1)
    def _finalize():
        pooled = gate_ref[...] * inv_p                          # (C, 1) mean
        h = jnp.maximum(
            jnp.dot(w1_ref[...].astype(jnp.float32), pooled,
                    preferred_element_type=jnp.float32)
            + b1_ref[...].astype(jnp.float32), 0.0)
        g = jnp.dot(w2_ref[...].astype(jnp.float32), h,
                    preferred_element_type=jnp.float32)
        gate_ref[...] = jax.nn.sigmoid(g + b2_ref[...].astype(jnp.float32))


def _rescale_kernel(x_ref, gate_ref, o_ref):
    # x_ref: (C, tp)   gate_ref: (C, 1) f32   o_ref: (C, tp)
    gate = gate_ref[...]
    o_ref[...] = (x_ref[...] * gate.astype(x_ref.dtype)).astype(o_ref.dtype)


def _two_pass_call(x3, w1c, b1c, w2c, b2c, *, N, C, Cm, P, budget, spatial_tile):
    isz = jnp.dtype(x3.dtype).itemsize

    if spatial_tile is None:
        # Rescale pass needs 2 in-bufs + 2 out-bufs of a (C, tp) tile; keep ~20% slack.
        tp = (budget // (5 * C * isz)) // 128 * 128
        tp = max(128, tp)
    else:
        tp = int(spatial_tile)
    if tp >= P:
        tp = P  # full spatial extent: legal for any P (block == full dim)
    nP = pl.cdiv(P, tp)
    ragged = (P % tp) != 0

    # ---- pass 1: gates (N, C, 1) = sigmoid(W2 relu(W1 mean_spatial(x) + b1) + b2) ----
    gate_kernel = functools.partial(_gate_kernel, p_total=P, tile_p=tp,
                                    ragged=ragged, inv_p=1.0 / P)
    gates = pl.pallas_call(
        gate_kernel,
        out_shape=jax.ShapeDtypeStruct((N, C, 1), jnp.float32),
        grid=(N, nP),                                   # reduction axis last
        in_specs=[
            pl.BlockSpec((None, C, tp), lambda n, p: (n, 0, p)),
            pl.BlockSpec((Cm, C), lambda n, p: (0, 0)),
            pl.BlockSpec((Cm, 1), lambda n, p: (0, 0)),
            pl.BlockSpec((C, Cm), lambda n, p: (0, 0)),
            pl.BlockSpec((C, 1), lambda n, p: (0, 0)),
        ],
        out_specs=pl.BlockSpec((None, C, 1), lambda n, p: (n, 0, 0)),  # resident accumulator
        compiler_params=pltpu.CompilerParams(
            dimension_semantics=("parallel", "arbitrary"),
            vmem_limit_bytes=budget,
        ),
        cost_estimate=pl.CostEstimate(
            flops=int(N * C * P + 4 * N * C * Cm),
            transcendentals=int(N * C),
            bytes_accessed=int(N * C * P * isz + N * C * 4),
        ),
    )(x3, w1c, b1c, w2c, b2c)

    # ---- pass 2: tiled elementwise rescale; single flattened parallel axis so both
    #      v7x TensorCores get work even for N == 1. ----
    total = N * nP
    # NOTE: if a profile shows exposed DMA at step boundaries, pipeline_mode=pl.Buffered(3)
    # on the x spec is the next knob; left at the default double-buffering here.
    out3 = pl.pallas_call(
        _rescale_kernel,
        out_shape=jax.ShapeDtypeStruct((N, C, P), x3.dtype),
        grid=(total,),
        in_specs=[
            pl.BlockSpec((None, C, tp), lambda i: (i // nP, 0, i % nP)),
            pl.BlockSpec((None, C, 1), lambda i: (i // nP, 0, 0)),
        ],
        out_specs=pl.BlockSpec((None, C, tp), lambda i: (i // nP, 0, i % nP)),
        compiler_params=pltpu.CompilerParams(
            dimension_semantics=("parallel",),
            vmem_limit_bytes=budget,
        ),
        cost_estimate=pl.CostEstimate(
            flops=int(N * C * P),
            transcendentals=0,
            bytes_accessed=int(2 * N * C * P * isz + N * C * 4),
        ),
    )(x3, gates)
    return out3


# --------------------------------------------------------------------------------------
# Public wrapper
# --------------------------------------------------------------------------------------

def calayer_forward(x, w1, b1, w2, b2, *, force_two_pass=False, spatial_tile=None):
    """CALayer forward.

    x: (N, C, H, W) NCHW.  w1: (Cm, C, 1, 1), b1: (Cm,), w2: (C, Cm, 1, 1), b2: (C,)."""
    N, C, H, W = x.shape
    Cm = w1.shape[0]
    P = H * W
    isz = jnp.dtype(x.dtype).itemsize

    # Pure reshape (NCHW is already lane-dense along spatial).  Lane-dense unmasked stores
    # require P % 128 == 0; other P is correct but uses masked vst (perf only).
    x3 = x.reshape(N, C, P)
    w1c = w1.reshape(Cm, C)      # column-layout: gate = sigmoid(W2 @ relu(W1 @ pooled + b1) + b2)
    w2c = w2.reshape(C, Cm)
    b1c = b1.reshape(Cm, 1)
    b2c = b2.reshape(C, 1)

    budget = _vmem_budget_bytes()
    slab = C * P * isz
    fused_need = 4 * slab + 2 * 1024 * 1024     # 2 in-bufs + 2 out-bufs + slack (B = 1)

    if (not force_two_pass) and fused_need <= budget:
        out3 = _fused_call(x3, w1c, b1c, w2c, b2c, N=N, C=C, Cm=Cm, P=P, budget=budget)
    else:
        out3 = _two_pass_call(x3, w1c, b1c, w2c, b2c, N=N, C=C, Cm=Cm, P=P,
                              budget=budget, spatial_tile=spatial_tile)
    return out3.reshape(N, C, H, W)


def reference(x, w1, b1, w2, b2):
    """Plain-JAX reference matching the PyTorch CALayer forward."""
    N, C, H, W = x.shape
    Cm = w1.shape[0]
    pooled = jnp.mean(x, axis=(2, 3))                                   # (N, C)
    h = jnp.maximum(pooled @ w1.reshape(Cm, C).T + b1, 0.0)             # (N, Cm)
    a = jax.nn.sigmoid(h @ w2.reshape(C, Cm).T + b2)                    # (N, C)
    return x * a[:, :, None, None]


if __name__ == "__main__":
    # CALayer(channel=32) -> squeeze to channel // 8 = 4
    N, C, H, W = 2, 32, 16, 16
    Cm = C // 8

    key = jax.random.PRNGKey(0)
    kx, kw1, kb1, kw2, kb2, kx2 = jax.random.split(key, 6)
    x = jax.random.normal(kx, (N, C, H, W), dtype=jnp.float32)
    w1 = jax.random.normal(kw1, (Cm, C, 1, 1), dtype=jnp.float32) / jnp.sqrt(C)
    b1 = 0.1 * jax.random.normal(kb1, (Cm,), dtype=jnp.float32)
    w2 = jax.random.normal(kw2, (C, Cm, 1, 1), dtype=jnp.float32) / jnp.sqrt(Cm)
    b2 = 0.1 * jax.random.normal(kb2, (C,), dtype=jnp.float32)

    # Fused single-pass path.
    out = jax.block_until_ready(calayer_forward(x, w1, b1, w2, b2))
    ref = reference(x, w1, b1, w2, b2)
    assert out.shape == (N, C, H, W), out.shape
    assert jnp.allclose(out, ref, atol=1e-5, rtol=1e-5), float(jnp.max(jnp.abs(out - ref)))

    # Two-pass tiled path (large-H*W fallback): N=1, ragged spatial tiling (P=320, tp=128).
    x2 = jax.random.normal(kx2, (1, C, 16, 20), dtype=jnp.float32)
    out2 = jax.block_until_ready(
        calayer_forward(x2, w1, b1, w2, b2, force_two_pass=True, spatial_tile=128))
    ref2 = reference(x2, w1, b1, w2, b2)
    assert jnp.allclose(out2, ref2, atol=1e-5, rtol=1e-5), float(jnp.max(jnp.abs(out2 - ref2)))

    print("KERNEL_OK")
</pallas_src>

<mosaic_0001>
module attributes {stable_mosaic.version = 11 : i64} {
  func.func @_fused_kernel(%arg0: i32, %arg1: memref<1x32x256xf32, #tpu.memory_space<vmem>>, %arg2: memref<4x32xf32, #tpu.memory_space<vmem>>, %arg3: memref<4x1xf32, #tpu.memory_space<vmem>>, %arg4: memref<32x4xf32, #tpu.memory_space<vmem>>, %arg5: memref<32x1xf32, #tpu.memory_space<vmem>>, %arg6: memref<1x32x256xf32, #tpu.memory_space<vmem>>) attributes {dimension_semantics = [#tpu.dimension_semantics<parallel>], iteration_bounds = array<i64: 2>, scalar_prefetch = 0 : i64, scratch_operands = 0 : i64, tpu.core_type = #tpu.core_type<tc>, window_params = [{transform_indices = @transform_0, window_bounds = array<i64: 1, 32, 256>}, {pipeline_mode = #tpu.pipeline_mode<synchronous>, transform_indices = @transform_1, window_bounds = array<i64: 4, 32>}, {pipeline_mode = #tpu.pipeline_mode<synchronous>, transform_indices = @transform_2, window_bounds = array<i64: 4, 1>}, {pipeline_mode = #tpu.pipeline_mode<synchronous>, transform_indices = @transform_3, window_bounds = array<i64: 32, 4>}, {pipeline_mode = #tpu.pipeline_mode<synchronous>, transform_indices = @transform_4, window_bounds = array<i64: 32, 1>}, {transform_indices = @transform_5, window_bounds = array<i64: 1, 32, 256>}]} {
    %c0 = arith.constant 0 : index
    %c0_0 = arith.constant 0 : index
    %0 = vector.load %arg2[%c0, %c0_0] : memref<4x32xf32, #tpu.memory_space<vmem>>, vector<4x32xf32>
    %c0_1 = arith.constant 0 : index
    %c0_2 = arith.constant 0 : index
    %1 = vector.load %arg3[%c0_1, %c0_2] : memref<4x1xf32, #tpu.memory_space<vmem>>, vector<4x1xf32>
    %c0_3 = arith.constant 0 : index
    %c0_4 = arith.constant 0 : index
    %2 = vector.load %arg4[%c0_3, %c0_4] : memref<32x4xf32, #tpu.memory_space<vmem>>, vector<32x4xf32>
    %c0_5 = arith.constant 0 : index
    %c0_6 = arith.constant 0 : index
    %3 = vector.load %arg5[%c0_5, %c0_6] : memref<32x1xf32, #tpu.memory_space<vmem>>, vector<32x1xf32>
    %c0_7 = arith.constant 0 : index
    %c0_8 = arith.constant 0 : index
    %c0_9 = arith.constant 0 : index
    %4 = vector.load %arg1[%c0_7, %c0_8, %c0_9] : memref<1x32x256xf32, #tpu.memory_space<vmem>>, vector<1x32x256xf32>
    %5 = vector.shape_cast %4 : vector<1x32x256xf32> to vector<32x256xf32>
    %cst = arith.constant dense<0.000000e+00> : vector<32xf32>
    %6 = vector.multi_reduction <add>, %5, %cst [1] : vector<32x256xf32> to vector<32xf32>
    %7 = vector.shape_cast %6 : vector<32xf32> to vector<32x1xf32>
    %cst_10 = arith.constant 3.906250e-03 : f32
    %8 = vector.broadcast %cst_10 : f32 to vector<32x1xf32>
    %9 = arith.mulf %7, %8 : vector<32x1xf32>
    %cst_11 = arith.constant dense<0.000000e+00> : vector<4x1xf32>
    %10 = tpu.matmul %0, %9, %cst_11 {dimension_numbers = #tpu.dot_dimension_numbers<[1], [0], [0], [1], [0, 0, 1, 1], [], []>} : vector<4x32xf32>, vector<32x1xf32>, vector<4x1xf32> -> vector<4x1xf32>
    %11 = arith.addf %10, %1 : vector<4x1xf32>
    %cst_12 = arith.constant 0.000000e+00 : f32
    %12 = vector.broadcast %cst_12 : f32 to vector<4x1xf32>
    %13 = arith.maximumf %11, %12 : vector<4x1xf32>
    %cst_13 = arith.constant dense<0.000000e+00> : vector<32x1xf32>
    %14 = tpu.matmul %2, %13, %cst_13 {dimension_numbers = #tpu.dot_dimension_numbers<[1], [0], [0], [1], [0, 0, 1, 1], [], []>} : vector<32x4xf32>, vector<4x1xf32>, vector<32x1xf32> -> vector<32x1xf32>
    %15 = arith.addf %14, %3 : vector<32x1xf32>
    %16 = arith.negf %15 : vector<32x1xf32>
    %17 = math.exp %16 : vector<32x1xf32>
    %cst_14 = arith.constant 1.000000e+00 : f32
    %18 = vector.broadcast %cst_14 : f32 to vector<32x1xf32>
    %19 = arith.addf %18, %17 : vector<32x1xf32>
    %20 = arith.divf %18, %19 : vector<32x1xf32>
    %21 = vector.broadcast %20 : vector<32x1xf32> to vector<32x256xf32>
    %22 = arith.mulf %5, %21 : vector<32x256xf32>
    %c0_15 = arith.constant 0 : index
    %c0_16 = arith.constant 0 : index
    %c0_17 = arith.constant 0 : index
    %23 = vector.load %arg6[%c0_15, %c0_16, %c0_17] : memref<1x32x256xf32, #tpu.memory_space<vmem>>, vector<1x32x256xf32>
    %24 = vector.shape_cast %23 : vector<1x32x256xf32> to vector<32x256xf32>
    %25 = vector.shape_cast %22 : vector<32x256xf32> to vector<1x32x256xf32>
    tpu.vector_store %arg6[%c0_15, %c0_16, %c0_17], %25 {strides = array<i32>} : memref<1x32x256xf32, #tpu.memory_space<vmem>>, vector<1x32x256xf32>,
    return
  }
  func.func @transform_0(%arg0: i32) -> (i32, i32, i32) {
    %c0_i32 = arith.constant 0 : i32
    %c0_i32_0 = arith.constant 0 : i32
    %c0_i32_1 = arith.constant 0 : i32
    return %arg0, %c0_i32, %c0_i32_0 : i32, i32, i32
  }
  func.func @transform_1(%arg0: i32) -> (i32, i32) {
    %c0_i32 = arith.constant 0 : i32
    %c0_i32_0 = arith.constant 0 : i32
    %c0_i32_1 = arith.constant 0 : i32
    return %c0_i32, %c0_i32_0 : i32, i32
  }
  func.func @transform_2(%arg0: i32) -> (i32, i32) {
    %c0_i32 = arith.constant 0 : i32
    %c0_i32_0 = arith.constant 0 : i32
    %c0_i32_1 = arith.constant 0 : i32
    return %c0_i32, %c0_i32_0 : i32, i32
  }
  func.func @transform_3(%arg0: i32) -> (i32, i32) {
    %c0_i32 = arith.constant 0 : i32
    %c0_i32_0 = arith.constant 0 : i32
    %c0_i32_1 = arith.constant 0 : i32
    return %c0_i32, %c0_i32_0 : i32, i32
  }
  func.func @transform_4(%arg0: i32) -> (i32, i32) {
    %c0_i32 = arith.constant 0 : i32
    %c0_i32_0 = arith.constant 0 : i32
    %c0_i32_1 = arith.constant 0 : i32
    return %c0_i32, %c0_i32_0 : i32, i32
  }
  func.func @transform_5(%arg0: i32) -> (i32, i32, i32) {
    %c0_i32 = arith.constant 0 : i32
    %c0_i32_0 = arith.constant 0 : i32
    %c0_i32_1 = arith.constant 0 : i32
    return %arg0, %c0_i32, %c0_i32_0 : i32, i32, i32
  }
}

</mosaic_0001>

<bundles_post_ra>
// kernel: tpu_custom_call.1
= control target key start
LH: loop header
LB: loop body
LE: loop exit
PB: predicated region body
PF: predicated region fallthrough
CT: control target
= control target key end

     0   :  { %10 = vsyncpa [#allocation3], 0  ;;  %s1100_s0 = inlined_call_operand.hbm [shape: f32[2,32,256], index: 0, kind: input, shape index: {}]   ;;  %s1101_s1 = inlined_call_operand.vmem [shape: f32[4,32], index: 1, kind: input, shape index: {}]   ;;  %s1102_s2 = inlined_call_operand.vmem [shape: f32[4,1], index: 2, kind: input, shape index: {}]   ;;  %s1103_s3 = inlined_call_operand.vmem [shape: f32[32,4], index: 3, kind: input, shape index: {}]   ;;  %s1104_s4 = inlined_call_operand.vmem [shape: f32[32,1], index: 4, kind: input, shape index: {}]   ;;  %s1105_s5 = inlined_call_operand.hbm [shape: f32[2,32,256], index: 5, kind: output, shape index: {}]  }
   0x1   :  { %12 = vsyncpa [#allocation3 + $0x1], 0 }
   0x2   :  { %13 = vsyncpa [#allocation4], 0 }
   0x3   :  { %15 = vsyncpa [#allocation4 + $0x1], 0  ;;  %s872_s18 = smov 0   ;;  %s874_s19 = smov 0  }
   0x4   :  { %s876_s20 = smov 0   ;;  %s878_s21 = smov 0  }
   0x5 LB: > { %s893_s22 = sadd.s32 4294967295, %s830_s21   ;;  %s601_s23 = sadd.s32 4294967294, %s830_s21   ;;  %s830_s21 = sphi %s878_s21, %s1118_s21   ;;  %s826_s20 = sphi %s876_s20, %s1117_s20   ;;  %s822_s19 = sphi %s874_s19, %s1116_s19   ;;  %s818_s18 = sphi %s872_s18, %s1115_s18  }
   0x6   : > { %s897_s24 = sadd.s32 1, %s830_s21   ;;  %s28_s25 = sadd.s32 1, %s826_s20 }
   0x7   : > { %s25_s26 = ssub.s32 %s830_s21, %s897_s24  ;;  %p35_p0 = scmp.ne.s32.totalorder %s826_s20, %s822_s19 }
   0x8   : > { %p26_p1 = scmp.eq.s32.totalorder %s25_s26, 0  ;;  %p36_p2 = scmp.eq.s32.totalorder %s830_s21, 0 }
   0x9   : > { %p41_p3 = scmp.ne.s32.totalorder %s822_s19, %s818_s18  ;;  %p42_p4 = scmp.eq.s32.totalorder %s893_s22, 0 }
   0xa   : > { %s909_s27 = scalar_select %p26_p1, %s826_s20, %s28_s25  }
   0xb   : > { %p911_p5 = por %p36_p2, %p35_p0  ;;  %p915_p6 = por %p42_p4, %p41_p3 }
   0xc   : > { %p149_p7 = scmp.eq.s32.totalorder %s893_s22, 1  ;;  %p155_p8 = scmp.eq.s32.totalorder %s601_s23, 1 }
   0xd   : > { %p674_p10 = scmp.lt.s32.totalorder %s830_s21, 2  ;;  %s187_s7 = sand.u32 1, %s826_s20  }
   0xe   : > { %p922_p11 = por %p149_p7, %p35_p0  ;;  %p926_p12 = por %p155_p8, %p41_p3 }
   0xf   : > { %s625_s8 = sshll.u32 %s830_s21, 10  ;;  %s604_s9 = sshll.u32 %s187_s7, 6 }
  0x10   : > { %s1109_s30 = scalar_select %p922_p11, 1, 0 }
  0x11   : > { %s1110_s6 = scalar_select %p926_p12, 1, 0 }
  0x12   : > { %s935_s12 = scalar_lea.hbm %s1100_s0, %s625_s8  ;;  %s191_s13 = scalar_lea.vmem [#allocation2], %s604_s9 }
  0x13   : > { %s198_s14 = sshll.u32 %s191_s13, 4  ;;  %p939_p13 = pnand %p674_p10, %p911_p5  ;;  %s943_s14 = int_to_ptr.vmem [resolvable:$true] %s198_s14 }
  0x14   : > { %s945_s16 = scalar_lea.sflag [#allocation3], %s187_s7  ;;  %s734_s17 = scalar_lea.hbm %s935_s12, 1024 }
  0x15   : > { %p735_p0 = scmp.ne.s32.totalorder %s935_s12, %s734_s17  ;;  %p736_p1 = pneg %p939_p13 }
  0x16   : > { %s739_s26 = scalar_lea.hbm %s1100_s0, 2048  ;;  %p740_p4 = scmp.lt.u32.totalorder %s935_s12, %s1100_s0 }
  0x17   : > { %p737_p2 = pnand %p736_p1, %p735_p0  ;;  %p741_p5 = scmp.lt.u32.totalorder %s739_s26, %s734_s17 }
  0x18   : > { %p743_p8 = scmp.lt.u32.totalorder %s734_s17, %s935_s12 }
  0x19   : > { %p738_p3 = pneg %p737_p2  ;;  %p742_p7 = por %p741_p5, %p740_p4 }
  0x1b   : > { %p744_p10 = por %p743_p8, %p742_p7 }
  0x1d   : > { %p745_p9 = pnand %p744_p10, %p738_p3 }
  0x1f   : > { %748 = shalt.err (!%p745_p9)
}
  0x20   : > { %s749_s7 = scalar_lea.vmem %s943_s14, 1024  ;;  %s832_s9 = smov [#allocation2]  }
  0x21   : > { %p750_p0 = scmp.ne.s32.totalorder %s943_s14, %s749_s7  ;;  %s754_s10 = sshll.u32 %s832_s9, 4  ;;  %s755_s10 = int_to_ptr.vmem [resolvable:$false] %s754_s10 }
  0x22   : > { %s756_s11 = scalar_lea.vmem %s755_s10, 2048  ;;  %p757_p11 = scmp.lt.s32.totalorder %s943_s14, %s755_s10 }
  0x23   : > { %p752_p2 = pnand %p750_p0, %p736_p1  ;;  %p758_p4 = scmp.lt.s32.totalorder %s756_s11, %s749_s7 }
  0x25   : > { %p753_p12 = pneg %p752_p2  ;;  %p759_p5 = por %p758_p4, %p757_p11 }
  0x27   : > { %p760_p7 = pnand %p759_p5, %p753_p12 }
  0x29   : > { %763 = shalt.err (!%p760_p7)
}
  0x2a   : > { %s833_s13 = smov 256   ;;  %s834_s17 = smov 16  }
  0x2b   : > { %669 = dma.hbm_to_vmem [thread:$0]  (!%p939_p13), %s935_s12, 1024, %s943_s14, %s945_s16, %s833_s13, %s833_s13, %s834_s17  }
  0x2c   : > { %p607_p9 = scmp.ge.s32.totalorder %s830_s21, 1  ;;  %p206_p1 = scmp.lt.s32.totalorder %s830_s21, 3 }
  0x2e   : > { %p207_p3 = pnand %p607_p9, %p206_p1 }
  0x2f   : > { %s976_s23 = sand.u32 (!%p207_p3), 1, %s822_s19  }
  0x30   : > { %210 = sbr.rel (%p207_p3) target bundleno = 829 (0x33d), region = 40  ;;  %s608_s25 = sshll.u32 (!%p207_p3), %s976_s23, 6 }
  0x31   : > { %s213_s26 = scalar_lea.sflag (!%p207_p3), [#allocation3], %s976_s23  ;;  %s216_s28 = scalar_lea.vmem (!%p207_p3), [#allocation2], %s608_s25 }
  0x37   : > { %809 = dma.done.wait (%p915_p6), %s213_s26, 1024  }
  0x38   : > { %811 = vsyncadd (%p915_p6), %s213_s26, 4294966272  ;;  %v986_v0 = vld [vmem:[%s216_s28 + $0x20] sm:$0xff]  ;;  %v988_v1 = vld [vmem:[%s216_s28 + $0x28] sm:$0xff]  ;;  %v835_v12 = vmov 0.0|0.0   ;;  %vm836_vm0 = vmmov 0   ;;  %v837_v13 = vmov 0.0  }
  0x39   : > { %v990_v2 = vld [vmem:[%s216_s28] sm:$0xff]  ;;  %v267_v3 = vadd.f32 %v988_v1, %v986_v0  ;;  %v994_v4 = vld [vmem:[%s216_s28 + $0x8] sm:$0xff]  ;;  %v996_v5 = vld [vmem:[%s216_s28 + $0x30] sm:$0xff]  ;;  %656 = vmatprep.subr.bf16.mxu0 %v835_v12  ;;  %645 = vmatprep.mubr.msk.f32.mxu0 %vm836_vm0, %v837_v13  ;;  %vm277_vm1 = vcmask 261120   ;;  %vm352_vm2 = vcmask 31744   ;;  %vm365_vm3 = vcmask 1043456  }
  0x3a   : > { %v998_v6 = vld [vmem:[%s216_s28 + $0x38] sm:$0xff]  ;;  %v261_v7 = vadd.f32 %v994_v4, %v990_v2  ;;  %v1002_v8 = vld [vmem:[%s216_s28 + $0x10] sm:$0xff]  ;;  %v243_v24 = vld [vmem:[%s1101_s1] sm:$0xf]  ;;  %v838_v34 = vmov 0   ;;  %s242_s7 = scalar_lea.vmem [#allocation5], %s608_s25 }
  0x3b   : > { %v1004_v9 = vld [vmem:[%s216_s28 + $0x18] sm:$0xff]  ;;  %268 = vadd.xlane.f32.xlu1 %v267_v3  ;;  %v270_v10 = vadd.f32 %v998_v6, %v996_v5  ;;  %v245_v25 = vld [vmem:[%s1103_s3] sm:$0xff]  ;;  %v246_v31 = vld [vmem:[%s1103_s3 + $0x8] sm:$0xff]  ;;  %716 = vset.pattern.permute.xlu0 %v838_v34  ;;  %s528_s9 = sshll.u32 %s242_s7, 4  ;;  %s626_s10 = sshll.u32 %s893_s22, 10  ;;  %s1049_s9 = int_to_ptr.vmem [resolvable:$true] %s528_s9 }
  0x3c   : > { %262 = vadd.xlane.f32.xlu0 %v261_v7  ;;  %v264_v11 = vadd.f32 %v1004_v9, %v1002_v8  ;;  %650 = vmatprep.mubr.msk.f32.mxu1 %vm352_vm2, %v245_v25  ;;  %v244_v26 = vld [vmem:[%s1102_s2] sm:$0xf]  ;;  %v247_v32 = vld [vmem:[%s1103_s3 + $0x10] sm:$0xff]  ;;  %v248_v33 = vld [vmem:[%s1103_s3 + $0x18] sm:$0xff]  ;;  %s1054_s13 = scalar_lea.hbm %s1105_s5, %s626_s10  ;;  %s515_s22 = scalar_lea.sflag [#allocation4], %s976_s23 }
  0x3d   : > { %717 = vset.pattern.permute.xlu1 %v838_v34  ;;  %v250_v35 = vld [vmem:[%s1104_s4 + $0x8] sm:$0xff]  ;;  %v249_v36 = vld [vmem:[%s1104_s4] sm:$0xff]  ;;  %v252_v41 = vld [vmem:[%s1104_s4 + $0x18] sm:$0xff]  ;;  %s764_s17 = scalar_lea.vmem %s1049_s9, 1024  ;;  %p1112_p11 = scmp.ne.s32.totalorder %s1109_s30, 0 }
  0x3e   : > { %v251_v43 = vld [vmem:[%s1104_s4 + $0x10] sm:$0xff]  ;;  %p765_p6 = scmp.ne.s32.totalorder %s1049_s9, %s764_s17  ;;  %s839_s26 = smov [#allocation5]  }
  0x3f   : > { %271 = vadd.xlane.f32.xlu1 %v270_v10  ;;  %s768_s28 = sshll.u32 %s839_s26, 4  ;;  %s769_s28 = int_to_ptr.vmem [resolvable:$false] %s768_s28 }
  0x40   : > { %265 = vadd.xlane.f32.xlu0 %v264_v11  ;;  %p766_p12 = pnand %p765_p6, %p1112_p11  ;;  %s770_s29 = scalar_lea.vmem %s769_s28, 2048 }
  0x41   : > { %p771_p8 = scmp.lt.s32.totalorder %s1049_s9, %s769_s28  ;;  %p772_p10 = scmp.lt.s32.totalorder %s770_s29, %s764_s17 }
  0x42   : > { %p767_p13 = pneg %p766_p12 }
  0x43   : > { %p773_p0 = por %p772_p10, %p771_p8 }
  0x45   : > { %p774_p2 = pnand %p773_p0, %p767_p13 }
  0xc8   : > { %v269_v14 = vpop.xlane.xlu1 %268 }
  0xc9   : > { %v263_v15 = vpop.xlane.xlu0 %262  ;;  %v275_v20 = vmul.f32 0.00390625, %v269_v14 }
  0xca   : > { %v273_v18 = vmul.f32 0.00390625, %v263_v15 }
  0xcc   : > { %v272_v16 = vpop.xlane.xlu1 %271 }
  0xcd   : > { %v266_v17 = vpop.xlane.xlu0 %265  ;;  %v276_v21 = vmul.f32 0.00390625, %v272_v16 }
  0xce   : > { %v274_v19 = vmul.f32 0.00390625, %v266_v17 }
  0xcf   : > { %v660_v23 = vpack.c.bf16 %v276_v21, %v275_v20 }
  0xd0   : > { %v657_v22 = vpack.c.bf16 %v274_v19, %v273_v18 }
  0xd2   : > { %658 = vmatpush3.bf16.msra.mxu0 %v657_v22 }
  0xd3   : > { %659 = vmatprep.subr.bf16.mxu0 %v835_v12 }
  0xd6   : > { %661 = vmatpush3.bf16.msra.mxu0 %v660_v23 }
  0xd9   : > { %646 = vmatmul.mubr.msk.f32.vlgmr.msra.gmra.mrb[0].mxu0 %vm277_vm1, %v243_v24 }
 0x1ac   : > { %v347_v27 = vpop.f32.mrb[0].mxu0 }
 0x1ad   : > { %v348_v28 = vadd.f32 %v347_v27, %v244_v26  ;;  %v647_v29 = vpop.f32.mrb[1].mxu0 }
 0x1af   : > { %v351_v30 = vmax.f32 %v348_v28, 0.0 }
 0x1b1   : > { %648 = vmatprep.subr.msk.mxu1 %vm365_vm3, %v351_v30 }
 0x1b2   : > { %649 = vmatpush3.msk.msra.mxu1 %vm365_vm3, %v351_v30 }
 0x1b3   : > { %651 = vmatmul.mubr.msk.f32.vlgmr.msra.gmra.mrb[0].mxu1 %vm352_vm2, %v246_v31 }
 0x1b4   : > { %653 = vmatprep.mubr.msk.f32.mxu1 %vm352_vm2, %v247_v32 }
 0x1b7   : > { %654 = vmatmul.mubr.msk.f32.gmra.mrb[2].mxu1 %vm352_vm2, %v248_v33 }
 0x286   : > { %v652_v37 = vpop.f32.mrb[0].mxu1 }
 0x287   : > { %v441_v38 = vadd.f32 %v652_v37, %v250_v35  ;;  %v435_v39 = vpop.f32.mrb[1].mxu1 }
 0x288   : > { %v436_v40 = vadd.f32 %v435_v39, %v249_v36 }
 0x289   : > { %v617_v42 = vmul.f32 -1.442695, %v441_v38 }
 0x28a   : > { %v616_v44 = vmul.f32 -1.442695, %v436_v40  ;;  %v655_v45 = vpop.f32.mrb[2].mxu1 }
 0x28b   : > { %718 = vpow2.f32 %v617_v42  ;;  %v451_v46 = vadd.f32 %v655_v45, %v252_v41  ;;  %v445_v47 = vpop.f32.mrb[3].mxu1 }
 0x28c   : > { %720 = vpow2.f32 %v616_v44  ;;  %v446_v48 = vadd.f32 %v445_v47, %v251_v43 }
 0x28d   : > { %v619_v49 = vmul.f32 -1.442695, %v451_v46 }
 0x28e   : > { %v618_v50 = vmul.f32 -1.442695, %v446_v48 }
 0x28f   : > { %722 = vpow2.f32 %v619_v49 }
 0x290   : > { %724 = vpow2.f32 %v618_v50 }
 0x295   : > { %v719_v51 = vpop.eup %718 }
 0x296   : > { %v721_v52 = vpop.eup %720  ;;  %v467_v53 = vadd.f32 1.0, %v719_v51 }
 0x297   : > { %v466_v54 = vadd.f32 1.0, %v721_v52 }
 0x298   : > { %726 = vrcp.f32 %v467_v53 }
 0x299   : > { %v723_v55 = vpop.eup %722  ;;  %728 = vrcp.f32 %v466_v54 }
 0x29a   : > { %v725_v56 = vpop.eup %724  ;;  %v469_v58 = vadd.f32 1.0, %v723_v55 }
 0x29b   : > { %v468_v57 = vadd.f32 1.0, %v725_v56 }
 0x29d   : > { %730 = vrcp.f32 %v468_v57 }
 0x29e   : > { %732 = vrcp.f32 %v469_v58 }
 0x2a2   : > { %v727_v59 = vpop.eup %726 }
 0x2a3   : > { %v729_v60 = vpop.eup %728  ;;  %485 = vperm.xlu1 %717, %v727_v59  }
 0x2a4   : > { %480 = vperm.xlu0 %716, %v729_v60  }
 0x2a7   : > { %v731_v61 = vpop.eup %730 }
 0x2a8   : > { %490 = vperm.xlu1 %717, %v731_v61   ;;  %v733_v62 = vpop.eup %732 }
 0x2ac   : > { %495 = vperm.xlu1 %717, %v733_v62  }
 0x322   : > { %v486_v63 = vpop.permute.xlu1 %485 }
 0x323   : > { %v500_v3 = vmul.f32 %v486_v63, %v1002_v8  ;;  %v501_v7 = vmul.f32 %v486_v63, %v1004_v9  ;;  %v481_v10 = vpop.permute.xlu0 %480 }
 0x324   : > { %v498_v11 = vmul.f32 %v481_v10, %v990_v2  ;;  %v499_v12 = vmul.f32 %v481_v10, %v994_v4 }
 0x325   : > { %508 = vst [vmem:[%s242_s7 + $0x10] sm:$0xff] %v500_v3  ;;  %509 = vst [vmem:[%s242_s7 + $0x18] sm:$0xff] %v501_v7 }
 0x326   : > { %506 = vst [vmem:[%s242_s7] sm:$0xff] %v498_v11  ;;  %507 = vst [vmem:[%s242_s7 + $0x8] sm:$0xff] %v499_v12 }
 0x327   : > { %v491_v13 = vpop.permute.xlu1 %490 }
 0x328   : > { %v502_v14 = vmul.f32 %v491_v13, %v986_v0  ;;  %v503_v8 = vmul.f32 %v491_v13, %v988_v1 }
 0x32a   : > { %510 = vst [vmem:[%s242_s7 + $0x20] sm:$0xff] %v502_v14  ;;  %511 = vst [vmem:[%s242_s7 + $0x28] sm:$0xff] %v503_v8 }
 0x32b   : > { %v496_v2 = vpop.permute.xlu1 %495 }
 0x32c   : > { %v504_v4 = vmul.f32 %v496_v2, %v996_v5  ;;  %v505_v0 = vmul.f32 %v496_v2, %v998_v6 }
 0x32e   : > { %512 = vst [vmem:[%s242_s7 + $0x30] sm:$0xff] %v504_v4  ;;  %513 = vst [vmem:[%s242_s7 + $0x38] sm:$0xff] %v505_v0 }
 0x32f   : > { %777 = shalt.err (!%p774_p2)
}
 0x330   : > { %s778_s12 = scalar_lea.hbm %s1054_s13, 1024  ;;  %s782_s16 = scalar_lea.hbm %s1105_s5, 2048 }
 0x331   : > { %p779_p4 = scmp.ne.s32.totalorder %s1054_s13, %s778_s12  ;;  %p783_p9 = scmp.lt.u32.totalorder %s1054_s13, %s1105_s5 }
 0x332   : > { %p784_p1 = scmp.lt.u32.totalorder %s782_s16, %s778_s12  ;;  %p786_p6 = scmp.lt.u32.totalorder %s778_s12, %s1054_s13 }
 0x333   : > { %p780_p5 = pnand %p779_p4, %p1112_p11 }
 0x334   : > { %p785_p3 = por %p784_p1, %p783_p9 }
 0x335   : > { %p781_p7 = pneg %p780_p5 }
 0x336   : > { %p787_p12 = por %p786_p6, %p785_p3 }
 0x338   : > { %p788_p13 = pnand %p787_p12, %p781_p7 }
 0x33a   : > { %791 = shalt.err (!%p788_p13)
}
 0x33b   : > { %s840_s10 = smov 256   ;;  %s841_s25 = smov 16  }
 0x33c   : > { %664 = dma.vmem_to_hbm [thread:$0]  (%p1112_p11), %s1049_s9, 1024, %s1054_s13, %s515_s22, %s840_s10, %s840_s10, %s841_s25  }
 0x33d PF: > { %s543_s11 = sand.u32 1, %s818_s18   ;;  %p1113_p8 = scmp.ne.s32.totalorder %s1110_s6, 0 }
 0x33e   : > { %p1114_p10 = scmp.ge.s32.totalorder %s830_s21, 2  ;;  %s544_s17 = scalar_lea.sflag [#allocation4], %s543_s11 }
 0x340   : > { %p671_p0 = pnand %p1114_p10, %p1113_p8 }
 0x342   : > { %813 = dma.done.wait (!%p671_p0), %s544_s17, 1024  }
 0x343   : > { %815 = vsyncadd (!%p671_p0), %s544_s17, 4294966272  ;;  %p18_p2 = scmp.ge.s32.totalorder %s897_s24, 4   ;;  %s1115_s18 = smov %s822_s19 }
 0x344   : > { %s1116_s19 = smov %s826_s20  ;;  %s1117_s20 = smov %s909_s27 }
 0x345   : > { %s1118_s21 = smov %s897_s24  ;;  %20 = sbr.rel (!%p18_p2) target bundleno = 5 (0x5), region = 85 }
 0x34c   :  { %549 = vsyncpa [#allocation3], 1 }
 0x34d   :  { %551 = vsyncpa [#allocation3 + $0x1], 1 }
 0x34e   :  { %552 = vsyncpa [#allocation4], 1 }
 0x34f   :  { %554 = vsyncpa [#allocation4 + $0x1], 1 }

</bundles_post_ra>
